<compile_context>
chip_gen: v5e
topology: v5e:2x2
jax: 0.10.0
libtpu: 0.0.40
codegen_flags: <defaults>
</compile_context>

<pallas_src>
import functools
import math

import jax
import jax.numpy as jnp
from jax.experimental import pallas as pl
from jax.experimental.pallas import tpu as pltpu

LANE = 128          # TPU lane width (last-dim padding target)
TILE_B = 128        # MXU-aligned batch tile for large batches


# --------------------------------------------------------------------------
# In-kernel math helpers
# --------------------------------------------------------------------------
def _layernorm_masked(x, w, b, mask, inv_n, eps=1e-5):
    """nn.LayerNorm semantics (biased var, eps inside rsqrt) over the TRUE
    feature count `1/inv_n`, on a lane-padded row.  `mask` zeroes padded lanes
    of (x - mean) so they do not pollute the variance.  w/b are zero-padded, so
    the output's padded lanes stay exactly 0."""
    mean = jnp.sum(x, axis=-1, keepdims=True) * inv_n      # x is 0 in padded lanes
    centered = (x - mean) * mask
    var = jnp.sum(centered * centered, axis=-1, keepdims=True) * inv_n
    return centered * jax.lax.rsqrt(var + eps) * w + b


# --------------------------------------------------------------------------
# Pallas kernel: the whole residual trunk for one batch tile.
# --------------------------------------------------------------------------
def resnet_kernel(
    x_ref,            # (tile_b, dp_in)  f32
    wf_ref, bf_ref,   # first_layer: (dp_in, dp) bf16, (1, dp) f32
    nw_ref, nb_ref,   # per-layer LayerNorm: (L, dp) f32, (L, dp) f32
    w0_ref, b0_ref,   # per-layer linear0: (L, dp, hp) bf16, (L, hp) f32
    w1_ref, b1_ref,   # per-layer linear1: (L, hp, dp) bf16, (L, dp) f32
    lnw_ref, lnb_ref,  # last_normalization: (1, dp) f32, (1, dp) f32
    wh_ref, bh_ref,    # head: (dp, dp_out) bf16, (1, dp_out) f32
    out_ref,           # (tile_b, dp_out) f32   -- head output
    hint_ref=None,     # (tile_b, dp)     f32   -- pre-head activation (d_out==1 only)
    *, d_model, emit_hint,
):
    dp = nw_ref.shape[1]
    # Hoisted constants (computed once per grid step, reused across layers).
    lane_idx = jax.lax.broadcasted_iota(jnp.int32, (1, dp), 1)
    mask = (lane_idx < d_model).astype(jnp.float32)
    inv_d = jnp.float32(1.0 / d_model)

    # first_layer
    x = x_ref[...]
    x = jnp.dot(x.astype(jnp.bfloat16), wf_ref[...],
                preferred_element_type=jnp.float32) + bf_ref[...]

    n_layers = nw_ref.shape[0]

    def layer_body(i, x):
        z = _layernorm_masked(x, nw_ref[i], nb_ref[i], mask, inv_d)
        z = jnp.dot(z.astype(jnp.bfloat16), w0_ref[i],
                    preferred_element_type=jnp.float32) + b0_ref[i]
        z = jnp.maximum(z, 0.0)          # main_activation = relu
        # hidden_dropout = 0.0 -> no-op (eval semantics)
        z = jnp.dot(z.astype(jnp.bfloat16), w1_ref[i],
                    preferred_element_type=jnp.float32) + b1_ref[i]
        # residual_dropout = 0.0 -> no-op
        return x + z

    x = jax.lax.fori_loop(0, n_layers, layer_body, x, unroll=True)

    x = _layernorm_masked(x, lnw_ref[0], lnb_ref[0], mask, inv_d)
    x = jnp.maximum(x, 0.0)              # last_activation = relu
    if emit_hint:                        # only materialized when d_out == 1
        hint_ref[...] = x
    out_ref[...] = jnp.dot(x.astype(jnp.bfloat16), wh_ref[...],
                           preferred_element_type=jnp.float32) + bh_ref[...]


# --------------------------------------------------------------------------
# Wrapper: embedding glue, lane/batch padding, batch-gridded pallas_call.
# --------------------------------------------------------------------------
def _pad_axis(a, axis, mult):
    pad = (-a.shape[axis]) % mult
    if pad == 0:
        return a
    widths = [(0, 0)] * a.ndim
    widths[axis] = (0, pad)
    return jnp.pad(a, widths)


def _pad_last(a):
    return _pad_axis(a, a.ndim - 1, LANE)


def resnet_forward(x_num, x_cat, params):
    """Returns (out, last_hint_layers) exactly like the PyTorch module (eval mode)."""
    # ---- glue: embedding lookup + concat (gather stays in plain JAX) ----
    feats = []
    if x_num is not None:
        feats.append(x_num)
    if x_cat is not None:
        idx = x_cat + params["category_offsets"][None, :]          # (B, n_cat)
        emb = jnp.take(params["emb_weight"], idx, axis=0)           # (B, n_cat, d_emb)
        feats.append(emb.reshape(x_cat.shape[0], -1))
    x = jnp.concatenate(feats, axis=-1).astype(jnp.float32)         # (B, d_in)

    B, d_in = x.shape
    d = params["norm_w"].shape[1]
    d_out = params["w_head"].shape[1]

    # ---- lane padding (zero-pad feature dims to multiples of 128) ----
    dp_in = d_in + (-d_in) % LANE
    dp = d + (-d) % LANE
    dp_out = d_out + (-d_out) % LANE

    # Weights -> bf16 (f32 accumulation in the dots); LN params / biases -> f32.
    wf = _pad_axis(_pad_last(params["w_first"]), 0, LANE)[:dp_in, :dp].astype(jnp.bfloat16)
    bf = _pad_last(params["b_first"])                               # (1, dp)
    nw = _pad_last(params["norm_w"])                                # (L, dp)
    nb = _pad_last(params["norm_b"])                                # (L, dp)
    w0 = _pad_axis(_pad_last(params["w0"]), 1, LANE).astype(jnp.bfloat16)   # (L, dp, hp)
    b0 = _pad_last(params["b0"])                                    # (L, hp)
    w1 = _pad_axis(_pad_last(params["w1"]), 1, LANE).astype(jnp.bfloat16)   # (L, hp, dp)
    b1 = _pad_last(params["b1"])                                    # (L, dp)
    lnw = _pad_last(params["last_norm_w"])                          # (1, dp)
    lnb = _pad_last(params["last_norm_b"])                          # (1, dp)
    wh = _pad_axis(_pad_last(params["w_head"]), 0, LANE).astype(jnp.bfloat16)  # (dp, dp_out)
    bh = _pad_last(params["b_head"])                                # (1, dp_out)

    # ---- batch tiling: 128 for big batches, round-to-8 for tiny ones ----
    b_rounded = B + (-B) % 8
    tile_b = TILE_B if b_rounded >= TILE_B else b_rounded
    x_p = _pad_axis(_pad_last(x), 0, tile_b)                        # (B_pad, dp_in)
    B_pad = x_p.shape[0]
    n_tiles = pl.cdiv(B_pad, tile_b)

    emit_hint = (d_out == 1)

    kernel_inputs = (x_p, wf, bf, nw, nb, w0, b0, w1, b1, lnw, lnb, wh, bh)

    def resident(a):
        # Weight spec: full-array block, resident across the batch grid axis.
        nd = a.ndim
        return pl.BlockSpec(a.shape, lambda i, _nd=nd: (0,) * _nd)

    in_specs = [pl.BlockSpec((tile_b, dp_in), lambda i: (i, 0))] + \
               [resident(a) for a in kernel_inputs[1:]]

    out_specs = [pl.BlockSpec((tile_b, dp_out), lambda i: (i, 0))]
    out_shape = [jax.ShapeDtypeStruct((B_pad, dp_out), jnp.float32)]
    if emit_hint:
        out_specs.append(pl.BlockSpec((tile_b, dp), lambda i: (i, 0)))
        out_shape.append(jax.ShapeDtypeStruct((B_pad, dp), jnp.float32))
    out_specs = tuple(out_specs)
    out_shape = tuple(out_shape)

    # VMEM budget: resident weights + double-buffered batch tiles (+ headroom).
    # (v7x: 64 MiB physical / 32 MiB scoped default — stay well under that.)
    weight_bytes = sum(int(a.size) * a.dtype.itemsize for a in kernel_inputs[1:])
    tile_bytes = 2 * 4 * tile_b * (dp_in + dp_out + (dp if emit_hint else 0))
    vmem_limit = int(min(64 * 2**20, max(32 * 2**20, 2 * (weight_bytes + tile_bytes))))

    results = pl.pallas_call(
        functools.partial(resnet_kernel, d_model=d, emit_hint=emit_hint),
        out_shape=out_shape,
        grid_spec=pltpu.PrefetchScalarGridSpec(
            num_scalar_prefetch=0,
            grid=(n_tiles,),
            in_specs=in_specs,
            out_specs=out_specs,
        ),
        compiler_params=pltpu.CompilerParams(
            dimension_semantics=("parallel",),
            vmem_limit_bytes=vmem_limit,
        ),
    )(*kernel_inputs)

    out_p = results[0]
    head = out_p[:B, :d_out]          # head output, true columns

    # torch: x = x.squeeze(-1); last_hint_layers = head output unless d_out == 1.
    if d_out != 1:
        return head, head
    else:
        pre_head = results[1][:B, :d]  # activation before the head
        return head[:, 0], pre_head


# --------------------------------------------------------------------------
# Deterministic parameter construction (mirrors module __init__ shapes)
# --------------------------------------------------------------------------
def make_params(key, *, d_numerical, categories, d_embedding, d, d_hidden_factor,
                n_layers, d_out):
    d_in = d_numerical + len(categories) * d_embedding
    d_hidden = int(d * d_hidden_factor)

    keys = jax.random.split(key, 16)
    ki = iter(keys)

    def linear(k, fan_in, fan_out):
        bound = 1.0 / math.sqrt(fan_in)
        kw, kb = jax.random.split(k)
        # stored transposed: (in, out) so the kernel does x @ W
        w = jax.random.uniform(kw, (fan_in, fan_out), jnp.float32, -bound, bound)
        b = jax.random.uniform(kb, (1, fan_out), jnp.float32, -bound, bound)
        return w, b

    params = {}
    # category embeddings (kaiming_uniform-ish deterministic init)
    n_emb = sum(categories)
    bound = math.sqrt(6.0 / d_embedding) / math.sqrt(1 + 5.0)
    params["emb_weight"] = jax.random.uniform(
        next(ki), (n_emb, d_embedding), jnp.float32, -bound, bound)
    offsets = [0]
    for c in categories[:-1]:
        offsets.append(offsets[-1] + c)
    params["category_offsets"] = jnp.asarray(offsets, dtype=jnp.int32)

    params["w_first"], params["b_first"] = linear(next(ki), d_in, d)

    nw, nb, w0s, b0s, w1s, b1s = [], [], [], [], [], []
    for _ in range(n_layers):
        nw.append(jnp.ones((d,), jnp.float32))
        nb.append(jnp.zeros((d,), jnp.float32))
        w0, b0 = linear(next(ki), d, d_hidden)   # relu -> no GLU doubling
        w1, b1 = linear(next(ki), d_hidden, d)
        w0s.append(w0); b0s.append(b0[0]); w1s.append(w1); b1s.append(b1[0])
    params["norm_w"] = jnp.stack(nw)            # (L, d)
    params["norm_b"] = jnp.stack(nb)            # (L, d)
    params["w0"] = jnp.stack(w0s)               # (L, d, d_hidden)
    params["b0"] = jnp.stack(b0s)               # (L, d_hidden)
    params["w1"] = jnp.stack(w1s)               # (L, d_hidden, d)
    params["b1"] = jnp.stack(b1s)               # (L, d)

    params["last_norm_w"] = jnp.ones((1, d), jnp.float32)
    params["last_norm_b"] = jnp.zeros((1, d), jnp.float32)
    params["w_head"], params["b_head"] = linear(next(ki), d, d_out)
    return params


# --------------------------------------------------------------------------
# Pure-JAX reference with matched precision (bf16 weights/activations into the
# dots, f32 accumulation) for a tight correctness check.
# --------------------------------------------------------------------------
def _ln_ref(x, w, b, eps=1e-5):
    mean = jnp.mean(x, axis=-1, keepdims=True)
    var = jnp.mean(jnp.square(x - mean), axis=-1, keepdims=True)
    return (x - mean) * jax.lax.rsqrt(var + eps) * w + b


def resnet_reference(x_num, x_cat, params):
    idx = x_cat + params["category_offsets"][None, :]
    emb = jnp.take(params["emb_weight"], idx, axis=0).reshape(x_cat.shape[0], -1)
    x = jnp.concatenate([x_num, emb], axis=-1).astype(jnp.float32)

    def bdot(a, w):
        return jnp.dot(a.astype(jnp.bfloat16), w.astype(jnp.bfloat16),
                       preferred_element_type=jnp.float32)

    x = bdot(x, params["w_first"]) + params["b_first"]
    L = params["norm_w"].shape[0]
    for i in range(L):
        z = _ln_ref(x, params["norm_w"][i], params["norm_b"][i])
        z = jnp.maximum(bdot(z, params["w0"][i]) + params["b0"][i], 0.0)
        z = bdot(z, params["w1"][i]) + params["b1"][i]
        x = x + z
    x = jnp.maximum(_ln_ref(x, params["last_norm_w"][0], params["last_norm_b"][0]), 0.0)
    pre_head = x
    out = bdot(x, params["w_head"]) + params["b_head"]
    return out, pre_head


if __name__ == "__main__":
    # small, module-consistent shapes
    B = 8
    d_numerical = 8
    categories = [3, 5, 7]
    d_embedding = 4
    d = 32
    d_hidden_factor = 2.0
    n_layers = 2
    d_out = 4

    key = jax.random.PRNGKey(0)
    kp, kx, kc = jax.random.split(key, 3)

    params = make_params(
        kp, d_numerical=d_numerical, categories=categories, d_embedding=d_embedding,
        d=d, d_hidden_factor=d_hidden_factor, n_layers=n_layers, d_out=d_out)

    x_num = jax.random.normal(kx, (B, d_numerical), jnp.float32)
    x_cat = jnp.stack(
        [jax.random.randint(jax.random.fold_in(kc, i), (B,), 0, c)
         for i, c in enumerate(categories)],
        axis=-1).astype(jnp.int32)

    out, last_hint = resnet_forward(x_num, x_cat, params)
    out = jax.block_until_ready(out)
    last_hint = jax.block_until_ready(last_hint)

    ref_out, _ = resnet_reference(x_num, x_cat, params)
    assert out.shape == (B, d_out)
    assert last_hint.shape == (B, d_out)
    assert jnp.allclose(out, ref_out, rtol=1e-2, atol=1e-2), "mismatch vs JAX reference"

    # also exercise the d_out == 1 path (squeeze + pre-head hint)
    params1 = make_params(
        jax.random.PRNGKey(1), d_numerical=d_numerical, categories=categories,
        d_embedding=d_embedding, d=d, d_hidden_factor=d_hidden_factor,
        n_layers=n_layers, d_out=1)
    out1, hint1 = resnet_forward(x_num, x_cat, params1)
    out1 = jax.block_until_ready(out1)
    ref_out1, ref_hint1 = resnet_reference(x_num, x_cat, params1)
    assert out1.shape == (B,)
    assert hint1.shape == (B, d)
    assert jnp.allclose(out1, ref_out1[:, 0], rtol=1e-2, atol=1e-2)
    assert jnp.allclose(hint1, ref_hint1, rtol=1e-2, atol=1e-2)

    print("KERNEL_OK")
</pallas_src>

<mosaic_0001>
module attributes {stable_mosaic.version = 11 : i64} {
  func.func @resnet_kernel(%arg0: i32, %arg1: memref<8x128xf32, #tpu.memory_space<vmem>>, %arg2: memref<128x128xbf16, #tpu.memory_space<vmem>>, %arg3: memref<1x128xf32, #tpu.memory_space<vmem>>, %arg4: memref<2x128xf32, #tpu.memory_space<vmem>>, %arg5: memref<2x128xf32, #tpu.memory_space<vmem>>, %arg6: memref<2x128x128xbf16, #tpu.memory_space<vmem>>, %arg7: memref<2x128xf32, #tpu.memory_space<vmem>>, %arg8: memref<2x128x128xbf16, #tpu.memory_space<vmem>>, %arg9: memref<2x128xf32, #tpu.memory_space<vmem>>, %arg10: memref<1x128xf32, #tpu.memory_space<vmem>>, %arg11: memref<1x128xf32, #tpu.memory_space<vmem>>, %arg12: memref<128x128xbf16, #tpu.memory_space<vmem>>, %arg13: memref<1x128xf32, #tpu.memory_space<vmem>>, %arg14: memref<8x128xf32, #tpu.memory_space<vmem>>) attributes {dimension_semantics = [#tpu.dimension_semantics<parallel>], iteration_bounds = array<i64: 1>, scalar_prefetch = 0 : i64, scratch_operands = 0 : i64, tpu.core_type = #tpu.core_type<tc>, window_params = [{transform_indices = @transform_0, window_bounds = array<i64: 8, 128>}, {pipeline_mode = #tpu.pipeline_mode<synchronous>, transform_indices = @transform_1, window_bounds = array<i64: 128, 128>}, {pipeline_mode = #tpu.pipeline_mode<synchronous>, transform_indices = @transform_2, window_bounds = array<i64: 1, 128>}, {pipeline_mode = #tpu.pipeline_mode<synchronous>, transform_indices = @transform_3, window_bounds = array<i64: 2, 128>}, {pipeline_mode = #tpu.pipeline_mode<synchronous>, transform_indices = @transform_4, window_bounds = array<i64: 2, 128>}, {pipeline_mode = #tpu.pipeline_mode<synchronous>, transform_indices = @transform_5, window_bounds = array<i64: 2, 128, 128>}, {pipeline_mode = #tpu.pipeline_mode<synchronous>, transform_indices = @transform_6, window_bounds = array<i64: 2, 128>}, {pipeline_mode = #tpu.pipeline_mode<synchronous>, transform_indices = @transform_7, window_bounds = array<i64: 2, 128, 128>}, {pipeline_mode = #tpu.pipeline_mode<synchronous>, transform_indices = @transform_8, window_bounds = array<i64: 2, 128>}, {pipeline_mode = #tpu.pipeline_mode<synchronous>, transform_indices = @transform_9, window_bounds = array<i64: 1, 128>}, {pipeline_mode = #tpu.pipeline_mode<synchronous>, transform_indices = @transform_10, window_bounds = array<i64: 1, 128>}, {pipeline_mode = #tpu.pipeline_mode<synchronous>, transform_indices = @transform_11, window_bounds = array<i64: 128, 128>}, {pipeline_mode = #tpu.pipeline_mode<synchronous>, transform_indices = @transform_12, window_bounds = array<i64: 1, 128>}, {transform_indices = @transform_13, window_bounds = array<i64: 8, 128>}]} {
    %0 = tpu.iota {dimensions = array<i32: 1>} : vector<1x128xi32>
    %c32_i32 = arith.constant 32 : i32
    %1 = vector.broadcast %c32_i32 : i32 to vector<1x128xi32>
    %2 = arith.cmpi slt, %0, %1 : vector<1x128xi32>
    %3 = arith.extui %2 : vector<1x128xi1> to vector<1x128xi32>
    %4 = arith.sitofp %3 : vector<1x128xi32> to vector<1x128xf32>
    %c0 = arith.constant 0 : index
    %c0_0 = arith.constant 0 : index
    %5 = vector.load %arg1[%c0, %c0_0] : memref<8x128xf32, #tpu.memory_space<vmem>>, vector<8x128xf32>
    %6 = arith.truncf %5 : vector<8x128xf32> to vector<8x128xbf16>
    %c0_1 = arith.constant 0 : index
    %c0_2 = arith.constant 0 : index
    %7 = vector.load %arg2[%c0_1, %c0_2] : memref<128x128xbf16, #tpu.memory_space<vmem>>, vector<128x128xbf16>
    %cst = arith.constant dense<0.000000e+00> : vector<8x128xf32>
    %8 = tpu.matmul %6, %7, %cst {dimension_numbers = #tpu.dot_dimension_numbers<[1], [0], [0], [1], [0, 0, 1, 1], [], []>} : vector<8x128xbf16>, vector<128x128xbf16>, vector<8x128xf32> -> vector<8x128xf32>
    %c0_3 = arith.constant 0 : index
    %c0_4 = arith.constant 0 : index
    %9 = vector.load %arg3[%c0_3, %c0_4] : memref<1x128xf32, #tpu.memory_space<vmem>>, vector<1x128xf32>
    %10 = vector.broadcast %9 : vector<1x128xf32> to vector<8x128xf32>
    %11 = arith.addf %8, %10 : vector<8x128xf32>
    %cst_5 = arith.constant 3.125000e-02 : f32
    %c0_i32 = arith.constant 0 : i32
    %12 = arith.index_cast %c0_i32 : i32 to index
    %c0_6 = arith.constant 0 : index
    %13 = vector.load %arg4[%12, %c0_6] : memref<2x128xf32, #tpu.memory_space<vmem>>, vector<1x128xf32>
    %14 = vector.shape_cast %13 : vector<1x128xf32> to vector<128xf32>
    %15 = arith.index_cast %c0_i32 : i32 to index
    %c0_7 = arith.constant 0 : index
    %16 = vector.load %arg5[%15, %c0_7] : memref<2x128xf32, #tpu.memory_space<vmem>>, vector<1x128xf32>
    %17 = vector.shape_cast %16 : vector<1x128xf32> to vector<128xf32>
    %cst_8 = arith.constant dense<0.000000e+00> : vector<8xf32>
    %18 = vector.multi_reduction <add>, %11, %cst_8 [1] : vector<8x128xf32> to vector<8xf32>
    %19 = vector.shape_cast %18 : vector<8xf32> to vector<8x1xf32>
    %20 = vector.broadcast %cst_5 : f32 to vector<8x1xf32>
    %21 = arith.mulf %19, %20 : vector<8x1xf32>
    %22 = vector.broadcast %21 : vector<8x1xf32> to vector<8x128xf32>
    %23 = arith.subf %11, %22 : vector<8x128xf32>
    %24 = vector.broadcast %4 : vector<1x128xf32> to vector<8x128xf32>
    %25 = arith.mulf %23, %24 : vector<8x128xf32>
    %26 = arith.mulf %25, %25 : vector<8x128xf32>
    %cst_9 = arith.constant dense<0.000000e+00> : vector<8xf32>
    %27 = vector.multi_reduction <add>, %26, %cst_9 [1] : vector<8x128xf32> to vector<8xf32>
    %28 = vector.shape_cast %27 : vector<8xf32> to vector<8x1xf32>
    %29 = vector.broadcast %cst_5 : f32 to vector<8x1xf32>
    %30 = arith.mulf %28, %29 : vector<8x1xf32>
    %cst_10 = arith.constant 9.99999974E-6 : f32
    %31 = vector.broadcast %cst_10 : f32 to vector<8x1xf32>
    %32 = arith.addf %30, %31 : vector<8x1xf32>
    %33 = math.rsqrt %32 : vector<8x1xf32>
    %34 = vector.broadcast %33 : vector<8x1xf32> to vector<8x128xf32>
    %35 = arith.mulf %25, %34 : vector<8x128xf32>
    %36 = vector.shape_cast %14 : vector<128xf32> to vector<1x128xf32>
    %37 = vector.broadcast %36 : vector<1x128xf32> to vector<8x128xf32>
    %38 = arith.mulf %35, %37 : vector<8x128xf32>
    %39 = vector.shape_cast %17 : vector<128xf32> to vector<1x128xf32>
    %40 = vector.broadcast %39 : vector<1x128xf32> to vector<8x128xf32>
    %41 = arith.addf %38, %40 : vector<8x128xf32>
    %42 = arith.truncf %41 : vector<8x128xf32> to vector<8x128xbf16>
    %43 = arith.index_cast %c0_i32 : i32 to index
    %c0_11 = arith.constant 0 : index
    %c0_12 = arith.constant 0 : index
    %44 = vector.load %arg6[%43, %c0_11, %c0_12] : memref<2x128x128xbf16, #tpu.memory_space<vmem>>, vector<1x128x128xbf16>
    %45 = vector.shape_cast %44 : vector<1x128x128xbf16> to vector<128x128xbf16>
    %cst_13 = arith.constant dense<0.000000e+00> : vector<8x128xf32>
    %46 = tpu.matmul %42, %45, %cst_13 {dimension_numbers = #tpu.dot_dimension_numbers<[1], [0], [0], [1], [0, 0, 1, 1], [], []>} : vector<8x128xbf16>, vector<128x128xbf16>, vector<8x128xf32> -> vector<8x128xf32>
    %47 = arith.index_cast %c0_i32 : i32 to index
    %c0_14 = arith.constant 0 : index
    %48 = vector.load %arg7[%47, %c0_14] : memref<2x128xf32, #tpu.memory_space<vmem>>, vector<1x128xf32>
    %49 = vector.shape_cast %48 : vector<1x128xf32> to vector<128xf32>
    %50 = vector.shape_cast %49 : vector<128xf32> to vector<1x128xf32>
    %51 = vector.broadcast %50 : vector<1x128xf32> to vector<8x128xf32>
    %52 = arith.addf %46, %51 : vector<8x128xf32>
    %cst_15 = arith.constant 0.000000e+00 : f32
    %53 = vector.broadcast %cst_15 : f32 to vector<8x128xf32>
    %54 = arith.maximumf %52, %53 : vector<8x128xf32>
    %55 = arith.truncf %54 : vector<8x128xf32> to vector<8x128xbf16>
    %56 = arith.index_cast %c0_i32 : i32 to index
    %c0_16 = arith.constant 0 : index
    %c0_17 = arith.constant 0 : index
    %57 = vector.load %arg8[%56, %c0_16, %c0_17] : memref<2x128x128xbf16, #tpu.memory_space<vmem>>, vector<1x128x128xbf16>
    %58 = vector.shape_cast %57 : vector<1x128x128xbf16> to vector<128x128xbf16>
    %cst_18 = arith.constant dense<0.000000e+00> : vector<8x128xf32>
    %59 = tpu.matmul %55, %58, %cst_18 {dimension_numbers = #tpu.dot_dimension_numbers<[1], [0], [0], [1], [0, 0, 1, 1], [], []>} : vector<8x128xbf16>, vector<128x128xbf16>, vector<8x128xf32> -> vector<8x128xf32>
    %60 = arith.index_cast %c0_i32 : i32 to index
    %c0_19 = arith.constant 0 : index
    %61 = vector.load %arg9[%60, %c0_19] : memref<2x128xf32, #tpu.memory_space<vmem>>, vector<1x128xf32>
    %62 = vector.shape_cast %61 : vector<1x128xf32> to vector<128xf32>
    %63 = vector.shape_cast %62 : vector<128xf32> to vector<1x128xf32>
    %64 = vector.broadcast %63 : vector<1x128xf32> to vector<8x128xf32>
    %65 = arith.addf %59, %64 : vector<8x128xf32>
    %66 = arith.addf %11, %65 : vector<8x128xf32>
    %c1_i32 = arith.constant 1 : i32
    %67 = arith.index_cast %c1_i32 : i32 to index
    %c0_20 = arith.constant 0 : index
    %68 = vector.load %arg4[%67, %c0_20] : memref<2x128xf32, #tpu.memory_space<vmem>>, vector<1x128xf32>
    %69 = vector.shape_cast %68 : vector<1x128xf32> to vector<128xf32>
    %70 = arith.index_cast %c1_i32 : i32 to index
    %c0_21 = arith.constant 0 : index
    %71 = vector.load %arg5[%70, %c0_21] : memref<2x128xf32, #tpu.memory_space<vmem>>, vector<1x128xf32>
    %72 = vector.shape_cast %71 : vector<1x128xf32> to vector<128xf32>
    %cst_22 = arith.constant dense<0.000000e+00> : vector<8xf32>
    %73 = vector.multi_reduction <add>, %66, %cst_22 [1] : vector<8x128xf32> to vector<8xf32>
    %74 = vector.shape_cast %73 : vector<8xf32> to vector<8x1xf32>
    %75 = vector.broadcast %cst_5 : f32 to vector<8x1xf32>
    %76 = arith.mulf %74, %75 : vector<8x1xf32>
    %77 = vector.broadcast %76 : vector<8x1xf32> to vector<8x128xf32>
    %78 = arith.subf %66, %77 : vector<8x128xf32>
    %79 = vector.broadcast %4 : vector<1x128xf32> to vector<8x128xf32>
    %80 = arith.mulf %78, %79 : vector<8x128xf32>
    %81 = arith.mulf %80, %80 : vector<8x128xf32>
    %cst_23 = arith.constant dense<0.000000e+00> : vector<8xf32>
    %82 = vector.multi_reduction <add>, %81, %cst_23 [1] : vector<8x128xf32> to vector<8xf32>
    %83 = vector.shape_cast %82 : vector<8xf32> to vector<8x1xf32>
    %84 = vector.broadcast %cst_5 : f32 to vector<8x1xf32>
    %85 = arith.mulf %83, %84 : vector<8x1xf32>
    %cst_24 = arith.constant 9.99999974E-6 : f32
    %86 = vector.broadcast %cst_24 : f32 to vector<8x1xf32>
    %87 = arith.addf %85, %86 : vector<8x1xf32>
    %88 = math.rsqrt %87 : vector<8x1xf32>
    %89 = vector.broadcast %88 : vector<8x1xf32> to vector<8x128xf32>
    %90 = arith.mulf %80, %89 : vector<8x128xf32>
    %91 = vector.shape_cast %69 : vector<128xf32> to vector<1x128xf32>
    %92 = vector.broadcast %91 : vector<1x128xf32> to vector<8x128xf32>
    %93 = arith.mulf %90, %92 : vector<8x128xf32>
    %94 = vector.shape_cast %72 : vector<128xf32> to vector<1x128xf32>
    %95 = vector.broadcast %94 : vector<1x128xf32> to vector<8x128xf32>
    %96 = arith.addf %93, %95 : vector<8x128xf32>
    %97 = arith.truncf %96 : vector<8x128xf32> to vector<8x128xbf16>
    %98 = arith.index_cast %c1_i32 : i32 to index
    %c0_25 = arith.constant 0 : index
    %c0_26 = arith.constant 0 : index
    %99 = vector.load %arg6[%98, %c0_25, %c0_26] : memref<2x128x128xbf16, #tpu.memory_space<vmem>>, vector<1x128x128xbf16>
    %100 = vector.shape_cast %99 : vector<1x128x128xbf16> to vector<128x128xbf16>
    %cst_27 = arith.constant dense<0.000000e+00> : vector<8x128xf32>
    %101 = tpu.matmul %97, %100, %cst_27 {dimension_numbers = #tpu.dot_dimension_numbers<[1], [0], [0], [1], [0, 0, 1, 1], [], []>} : vector<8x128xbf16>, vector<128x128xbf16>, vector<8x128xf32> -> vector<8x128xf32>
    %102 = arith.index_cast %c1_i32 : i32 to index
    %c0_28 = arith.constant 0 : index
    %103 = vector.load %arg7[%102, %c0_28] : memref<2x128xf32, #tpu.memory_space<vmem>>, vector<1x128xf32>
    %104 = vector.shape_cast %103 : vector<1x128xf32> to vector<128xf32>
    %105 = vector.shape_cast %104 : vector<128xf32> to vector<1x128xf32>
    %106 = vector.broadcast %105 : vector<1x128xf32> to vector<8x128xf32>
    %107 = arith.addf %101, %106 : vector<8x128xf32>
    %cst_29 = arith.constant 0.000000e+00 : f32
    %108 = vector.broadcast %cst_29 : f32 to vector<8x128xf32>
    %109 = arith.maximumf %107, %108 : vector<8x128xf32>
    %110 = arith.truncf %109 : vector<8x128xf32> to vector<8x128xbf16>
    %111 = arith.index_cast %c1_i32 : i32 to index
    %c0_30 = arith.constant 0 : index
    %c0_31 = arith.constant 0 : index
    %112 = vector.load %arg8[%111, %c0_30, %c0_31] : memref<2x128x128xbf16, #tpu.memory_space<vmem>>, vector<1x128x128xbf16>
    %113 = vector.shape_cast %112 : vector<1x128x128xbf16> to vector<128x128xbf16>
    %cst_32 = arith.constant dense<0.000000e+00> : vector<8x128xf32>
    %114 = tpu.matmul %110, %113, %cst_32 {dimension_numbers = #tpu.dot_dimension_numbers<[1], [0], [0], [1], [0, 0, 1, 1], [], []>} : vector<8x128xbf16>, vector<128x128xbf16>, vector<8x128xf32> -> vector<8x128xf32>
    %115 = arith.index_cast %c1_i32 : i32 to index
    %c0_33 = arith.constant 0 : index
    %116 = vector.load %arg9[%115, %c0_33] : memref<2x128xf32, #tpu.memory_space<vmem>>, vector<1x128xf32>
    %117 = vector.shape_cast %116 : vector<1x128xf32> to vector<128xf32>
    %118 = vector.shape_cast %117 : vector<128xf32> to vector<1x128xf32>
    %119 = vector.broadcast %118 : vector<1x128xf32> to vector<8x128xf32>
    %120 = arith.addf %114, %119 : vector<8x128xf32>
    %121 = arith.addf %66, %120 : vector<8x128xf32>
    %c2_i32 = arith.constant 2 : i32
    %c0_34 = arith.constant 0 : index
    %c0_35 = arith.constant 0 : index
    %122 = vector.load %arg10[%c0_34, %c0_35] : memref<1x128xf32, #tpu.memory_space<vmem>>, vector<1x128xf32>
    %123 = vector.shape_cast %122 : vector<1x128xf32> to vector<128xf32>
    %c0_36 = arith.constant 0 : index
    %c0_37 = arith.constant 0 : index
    %124 = vector.load %arg11[%c0_36, %c0_37] : memref<1x128xf32, #tpu.memory_space<vmem>>, vector<1x128xf32>
    %125 = vector.shape_cast %124 : vector<1x128xf32> to vector<128xf32>
    %cst_38 = arith.constant dense<0.000000e+00> : vector<8xf32>
    %126 = vector.multi_reduction <add>, %121, %cst_38 [1] : vector<8x128xf32> to vector<8xf32>
    %127 = vector.shape_cast %126 : vector<8xf32> to vector<8x1xf32>
    %cst_39 = arith.constant 3.125000e-02 : f32
    %128 = vector.broadcast %cst_39 : f32 to vector<8x1xf32>
    %129 = arith.mulf %127, %128 : vector<8x1xf32>
    %130 = vector.broadcast %129 : vector<8x1xf32> to vector<8x128xf32>
    %131 = arith.subf %121, %130 : vector<8x128xf32>
    %132 = vector.broadcast %4 : vector<1x128xf32> to vector<8x128xf32>
    %133 = arith.mulf %131, %132 : vector<8x128xf32>
    %134 = arith.mulf %133, %133 : vector<8x128xf32>
    %cst_40 = arith.constant dense<0.000000e+00> : vector<8xf32>
    %135 = vector.multi_reduction <add>, %134, %cst_40 [1] : vector<8x128xf32> to vector<8xf32>
    %136 = vector.shape_cast %135 : vector<8xf32> to vector<8x1xf32>
    %cst_41 = arith.constant 3.125000e-02 : f32
    %137 = vector.broadcast %cst_41 : f32 to vector<8x1xf32>
    %138 = arith.mulf %136, %137 : vector<8x1xf32>
    %cst_42 = arith.constant 9.99999974E-6 : f32
    %139 = vector.broadcast %cst_42 : f32 to vector<8x1xf32>
    %140 = arith.addf %138, %139 : vector<8x1xf32>
    %141 = math.rsqrt %140 : vector<8x1xf32>
    %142 = vector.broadcast %141 : vector<8x1xf32> to vector<8x128xf32>
    %143 = arith.mulf %133, %142 : vector<8x128xf32>
    %144 = vector.shape_cast %123 : vector<128xf32> to vector<1x128xf32>
    %145 = vector.broadcast %144 : vector<1x128xf32> to vector<8x128xf32>
    %146 = arith.mulf %143, %145 : vector<8x128xf32>
    %147 = vector.shape_cast %125 : vector<128xf32> to vector<1x128xf32>
    %148 = vector.broadcast %147 : vector<1x128xf32> to vector<8x128xf32>
    %149 = arith.addf %146, %148 : vector<8x128xf32>
    %cst_43 = arith.constant 0.000000e+00 : f32
    %150 = vector.broadcast %cst_43 : f32 to vector<8x128xf32>
    %151 = arith.maximumf %149, %150 : vector<8x128xf32>
    %152 = arith.truncf %151 : vector<8x128xf32> to vector<8x128xbf16>
    %c0_44 = arith.constant 0 : index
    %c0_45 = arith.constant 0 : index
    %153 = vector.load %arg12[%c0_44, %c0_45] : memref<128x128xbf16, #tpu.memory_space<vmem>>, vector<128x128xbf16>
    %cst_46 = arith.constant dense<0.000000e+00> : vector<8x128xf32>
    %154 = tpu.matmul %152, %153, %cst_46 {dimension_numbers = #tpu.dot_dimension_numbers<[1], [0], [0], [1], [0, 0, 1, 1], [], []>} : vector<8x128xbf16>, vector<128x128xbf16>, vector<8x128xf32> -> vector<8x128xf32>
    %c0_47 = arith.constant 0 : index
    %c0_48 = arith.constant 0 : index
    %155 = vector.load %arg13[%c0_47, %c0_48] : memref<1x128xf32, #tpu.memory_space<vmem>>, vector<1x128xf32>
    %156 = vector.broadcast %155 : vector<1x128xf32> to vector<8x128xf32>
    %157 = arith.addf %154, %156 : vector<8x128xf32>
    %c0_49 = arith.constant 0 : index
    %c0_50 = arith.constant 0 : index
    %158 = vector.load %arg14[%c0_49, %c0_50] : memref<8x128xf32, #tpu.memory_space<vmem>>, vector<8x128xf32>
    tpu.vector_store %arg14[%c0_49, %c0_50], %157 {strides = array<i32>} : memref<8x128xf32, #tpu.memory_space<vmem>>, vector<8x128xf32>,
    return
  }
  func.func @transform_0(%arg0: i32) -> (i32, i32) {
    %c0_i32 = arith.constant 0 : i32
    %c0_i32_0 = arith.constant 0 : i32
    return %arg0, %c0_i32 : i32, i32
  }
  func.func @transform_1(%arg0: i32) -> (i32, i32) {
    %c0_i32 = arith.constant 0 : i32
    %c0_i32_0 = arith.constant 0 : i32
    %c0_i32_1 = arith.constant 0 : i32
    return %c0_i32, %c0_i32_0 : i32, i32
  }
  func.func @transform_2(%arg0: i32) -> (i32, i32) {
    %c0_i32 = arith.constant 0 : i32
    %c0_i32_0 = arith.constant 0 : i32
    %c0_i32_1 = arith.constant 0 : i32
    return %c0_i32, %c0_i32_0 : i32, i32
  }
  func.func @transform_3(%arg0: i32) -> (i32, i32) {
    %c0_i32 = arith.constant 0 : i32
    %c0_i32_0 = arith.constant 0 : i32
    %c0_i32_1 = arith.constant 0 : i32
    return %c0_i32, %c0_i32_0 : i32, i32
  }
  func.func @transform_4(%arg0: i32) -> (i32, i32) {
    %c0_i32 = arith.constant 0 : i32
    %c0_i32_0 = arith.constant 0 : i32
    %c0_i32_1 = arith.constant 0 : i32
    return %c0_i32, %c0_i32_0 : i32, i32
  }
  func.func @transform_5(%arg0: i32) -> (i32, i32, i32) {
    %c0_i32 = arith.constant 0 : i32
    %c0_i32_0 = arith.constant 0 : i32
    %c0_i32_1 = arith.constant 0 : i32
    %c0_i32_2 = arith.constant 0 : i32
    return %c0_i32, %c0_i32_0, %c0_i32_1 : i32, i32, i32
  }
  func.func @transform_6(%arg0: i32) -> (i32, i32) {
    %c0_i32 = arith.constant 0 : i32
    %c0_i32_0 = arith.constant 0 : i32
    %c0_i32_1 = arith.constant 0 : i32
    return %c0_i32, %c0_i32_0 : i32, i32
  }
  func.func @transform_7(%arg0: i32) -> (i32, i32, i32) {
    %c0_i32 = arith.constant 0 : i32
    %c0_i32_0 = arith.constant 0 : i32
    %c0_i32_1 = arith.constant 0 : i32
    %c0_i32_2 = arith.constant 0 : i32
    return %c0_i32, %c0_i32_0, %c0_i32_1 : i32, i32, i32
  }
  func.func @transform_8(%arg0: i32) -> (i32, i32) {
    %c0_i32 = arith.constant 0 : i32
    %c0_i32_0 = arith.constant 0 : i32
    %c0_i32_1 = arith.constant 0 : i32
    return %c0_i32, %c0_i32_0 : i32, i32
  }
  func.func @transform_9(%arg0: i32) -> (i32, i32) {
    %c0_i32 = arith.constant 0 : i32
    %c0_i32_0 = arith.constant 0 : i32
    %c0_i32_1 = arith.constant 0 : i32
    return %c0_i32, %c0_i32_0 : i32, i32
  }
  func.func @transform_10(%arg0: i32) -> (i32, i32) {
    %c0_i32 = arith.constant 0 : i32
    %c0_i32_0 = arith.constant 0 : i32
    %c0_i32_1 = arith.constant 0 : i32
    return %c0_i32, %c0_i32_0 : i32, i32
  }
  func.func @transform_11(%arg0: i32) -> (i32, i32) {
    %c0_i32 = arith.constant 0 : i32
    %c0_i32_0 = arith.constant 0 : i32
    %c0_i32_1 = arith.constant 0 : i32
    return %c0_i32, %c0_i32_0 : i32, i32
  }
  func.func @transform_12(%arg0: i32) -> (i32, i32) {
    %c0_i32 = arith.constant 0 : i32
    %c0_i32_0 = arith.constant 0 : i32
    %c0_i32_1 = arith.constant 0 : i32
    return %c0_i32, %c0_i32_0 : i32, i32
  }
  func.func @transform_13(%arg0: i32) -> (i32, i32) {
    %c0_i32 = arith.constant 0 : i32
    %c0_i32_0 = arith.constant 0 : i32
    return %arg0, %c0_i32 : i32, i32
  }
}

</mosaic_0001>

<bundles_post_ra>
// kernel: tpu_custom_call.1
= control target key start
LH: loop header
LB: loop body
LE: loop exit
PB: predicated region body
PF: predicated region fallthrough
CT: control target
= control target key end

     0   :  { %18 = vsyncpa [#allocation3], 0  ;;  %s1382_s0 = inlined_call_operand.hbm [shape: f32[8,128], index: 0, kind: input, shape index: {}]   ;;  %s1383_s1 = inlined_call_operand.hbm [shape: bf16[128,128], index: 1, kind: input, shape index: {}]   ;;  %s1384_s2 = inlined_call_operand.hbm [shape: f32[1,128], index: 2, kind: input, shape index: {}]   ;;  %s1385_s3 = inlined_call_operand.vmem [shape: f32[2,128], index: 3, kind: input, shape index: {}]   ;;  %s1386_s4 = inlined_call_operand.hbm [shape: f32[2,128], index: 4, kind: input, shape index: {}]   ;;  %s1387_s5 = inlined_call_operand.hbm [shape: bf16[2,128,128], index: 5, kind: input, shape index: {}]   ;;  %s1388_s6 = inlined_call_operand.vmem [shape: f32[2,128], index: 6, kind: input, shape index: {}]   ;;  %s1389_s7 = inlined_call_operand.hbm [shape: bf16[2,128,128], index: 7, kind: input, shape index: {}]   ;;  %s1390_s8 = inlined_call_operand.vmem [shape: f32[2,128], index: 8, kind: input, shape index: {}]   ;;  %s1391_s9 = inlined_call_operand.vmem [shape: f32[1,128], index: 9, kind: input, shape index: {}]   ;;  %s1392_s10 = inlined_call_operand.vmem [shape: f32[1,128], index: 10, kind: input, shape index: {}]   ;;  %s1393_s11 = inlined_call_operand.hbm [shape: bf16[128,128], index: 11, kind: input, shape index: {}]   ;;  %s1394_s12 = inlined_call_operand.vmem [shape: f32[1,128], index: 12, kind: input, shape index: {}]   ;;  %s1395_s13 = inlined_call_operand.hbm [shape: f32[8,128], index: 13, kind: output, shape index: {}]  }
   0x1   :  { %19 = vsyncpa [#allocation6], 0 }
   0x2   :  { %20 = vsyncpa [#allocation9], 0 }
   0x3   :  { %21 = vsyncpa [#allocation12], 0  ;;  %s38_s27 = sshll.u32 %s1383_s1, 4  ;;  %s39_s27 = int_to_ptr.hbm [resolvable:$true] %s38_s27 }
   0x4   :  { %22 = vsyncpa [#allocation4], 0  ;;  %s1223_s28 = smov [#allocation5]   ;;  %s65_s15 = sshll.u32 %s1386_s4, 4  ;;  %s66_s15 = int_to_ptr.hbm [resolvable:$true] %s65_s15 }
   0x5   :  { %s40_s29 = sshll.u32 %s1223_s28, 4  ;;  %s1224_s16 = smov 64   ;;  %s41_s29 = int_to_ptr.vmem [resolvable:$true] %s40_s29 }
   0x6   :  { %s1225_s17 = smov 4   ;;  %s1226_s18 = smov [#allocation8]  }
   0x7   :  { %46 = dma.hbm_to_vmem [thread:$0]  %s39_s27, 1024, %s41_s29, [#allocation6], %s1224_s16, %s1224_s16, %s1225_s17  }
   0x8   :  { %s67_s19 = sshll.u32 %s1226_s18, 4  ;;  %s90_s21 = sshll.u32 %s1389_s7, 4  ;;  %s68_s19 = int_to_ptr.vmem [resolvable:$true] %s67_s19  ;;  %s91_s21 = int_to_ptr.hbm [resolvable:$true] %s90_s21 }
   0x9   :  { %70 = dma.hbm_to_vmem [thread:$0]  %s66_s15, 32, %s68_s19, [#allocation9]  }
   0xa   :  { %s28_s4 = sshll.u32 %s1382_s0, 4  ;;  %s1227_s24 = smov [#allocation11]   ;;  %s29_s4 = int_to_ptr.hbm [resolvable:$true] %s28_s4 }
   0xb   :  { %s92_s25 = sshll.u32 %s1227_s24, 4  ;;  %s1228_s26 = smov [#allocation2]   ;;  %s93_s25 = int_to_ptr.vmem [resolvable:$true] %s92_s25 }
   0xc   :  { %98 = dma.hbm_to_vmem [thread:$0]  %s91_s21, 2048, %s93_s25, [#allocation12], %s1224_s16, %s1224_s16, %s1225_s17  }
   0xd   :  { %s30_s27 = sshll.u32 %s1228_s26, 4  ;;  %s52_s7 = sshll.u32 %s1384_s2, 4  ;;  %s31_s27 = int_to_ptr.vmem [resolvable:$true] %s30_s27  ;;  %s53_s7 = int_to_ptr.hbm [resolvable:$true] %s52_s7 }
   0xe   :  { %33 = dma.hbm_to_vmem [thread:$0]  %s29_s4, 128, %s31_s27, [#allocation3]  }
   0xf   :  { %s75_s0 = sshll.u32 %s1387_s5, 4  ;;  %s1229_s15 = smov [#allocation7]   ;;  %s76_s0 = int_to_ptr.hbm [resolvable:$true] %s75_s0 }
  0x10   :  { %s54_s18 = sshll.u32 %s1229_s15, 4  ;;  %s1230_s19 = smov [#allocation10]   ;;  %s55_s18 = int_to_ptr.vmem [resolvable:$true] %s54_s18 }
  0x11   :  { %57 = dma.hbm_to_vmem [thread:$0]  %s53_s7, 16, %s55_s18, [#allocation6]  }
  0x12   :  { %s77_s20 = sshll.u32 %s1230_s19, 4  ;;  %s109_s22 = sshll.u32 %s1393_s11, 4  ;;  %s78_s20 = int_to_ptr.vmem [resolvable:$true] %s77_s20  ;;  %s110_s22 = int_to_ptr.hbm [resolvable:$true] %s109_s22 }
  0x13   :  { %83 = dma.hbm_to_vmem [thread:$0]  %s76_s0, 2048, %s78_s20, [#allocation9], %s1224_s16, %s1224_s16, %s1225_s17  }
  0x14   :  { %s1231_s2 = smov [#allocation13]  }
  0x15   :  { %s111_s23 = sshll.u32 %s1231_s2, 4  ;;  %s112_s23 = int_to_ptr.vmem [resolvable:$true] %s111_s23 }
  0x16   :  { %117 = dma.hbm_to_vmem [thread:$0]  %s110_s22, 1024, %s112_s23, [#allocation12], %s1224_s16, %s1224_s16, %s1225_s17  }
  0x17   :  { %1213 = dma.done.wait [#allocation3], 128  }
  0x18   :  { %1214 = vsyncadd [#allocation3], 4294967168 }
  0x19   :  { %1215 = dma.done.wait [#allocation6], 1040  }
  0x1a   :  { %1216 = vsyncadd [#allocation6], 4294966256 }
  0x1b   :  { %1217 = dma.done.wait [#allocation9], 2080  }
  0x1c   :  { %1218 = vsyncadd [#allocation9], 4294965216 }
  0x1d   :  { %1219 = dma.done.wait [#allocation12], 3072  }
  0x1e   :  { %1220 = vsyncadd [#allocation12], 4294964224  ;;  %v951_v0 = vld [vmem:[#allocation5 + $0x38] sm:$0xff]  ;;  %v950_v1 = vld [vmem:[#allocation5 + $0x30] sm:$0xff]  ;;  %v148_v15 = vlaneseq  ;;  %v1232_v19 = vmov 0.0   ;;  %s1233_s15 = smov [#allocation14]  }
  0x1f   :  { %223 = vmatpush.bf16.msra.mxu0 %v951_v0  ;;  %v949_v2 = vld [vmem:[#allocation5 + $0x28] sm:$0xff]  ;;  %v948_v3 = vld [vmem:[#allocation5 + $0x20] sm:$0xff]  ;;  %v947_v4 = vld [vmem:[#allocation5 + $0x18] sm:$0xff]  ;;  %s736_s18 = sshll.u32 %s1233_s15, 4  ;;  %s737_s18 = int_to_ptr.vmem [resolvable:$true] %s736_s18 }
  0x20   :  { %v946_v5 = vld [vmem:[#allocation5 + $0x10] sm:$0xff]  ;;  %v945_v6 = vld [vmem:[#allocation5 + $0x8] sm:$0xff]  ;;  %v944_v7 = vld [vmem:[#allocation5] sm:$0xff]  ;;  %v149_v16 = vand.u32 127, %v148_v15 }
  0x21   :  { %v153_v8 = vld [vmem:[#allocation2] sm:$0xff]  ;;  %v1003_v10 = vld [vmem:[#allocation7] ss:$0 sm:$0xff]  ;;  %v957_v25 = vld [vmem:[#allocation10 + $0x28] sm:$0xff] }
  0x22   :  { %v154_v9 = vpack.c.bf16 %v153_v8, %v153_v8  ;;  %v959_v14 = vld [vmem:[#allocation10 + $0x38] sm:$0xff]  ;;  %vm150_vm0 = vcmp.lt.s32.totalorder %v149_v16, 32  ;;  %v958_v24 = vld [vmem:[#allocation10 + $0x30] sm:$0xff]  ;;  %v956_v26 = vld [vmem:[#allocation10 + $0x20] sm:$0xff] }
  0x23   :  { %224 = vmatpush.bf16.msra.mxu0 %v950_v1  ;;  %330 = vmatpush.bf16.msra.mxu1 %v959_v14  ;;  %v1340_v20 = vsel %vm150_vm0, 1.0, %v1232_v19  ;;  %v955_v27 = vld [vmem:[#allocation10 + $0x18] sm:$0xff]  ;;  %v954_v28 = vld [vmem:[#allocation10 + $0x10] sm:$0xff]  ;;  %v953_v29 = vld [vmem:[#allocation10 + $0x8] sm:$0xff] }
  0x24   :  { %v952_v30 = vld [vmem:[#allocation10] sm:$0xff]  ;;  %v967_v31 = vld [vmem:[#allocation11 + $0x38] sm:$0xff]  ;;  %v966_v34 = vld [vmem:[#allocation11 + $0x30] sm:$0xff] }
  0x25   :  { %411 = vmatpush.bf16.msra.mxu2 %v967_v31  ;;  %v965_v36 = vld [vmem:[#allocation11 + $0x28] sm:$0xff]  ;;  %v964_v37 = vld [vmem:[#allocation11 + $0x20] sm:$0xff]  ;;  %v963_v40 = vld [vmem:[#allocation11 + $0x18] sm:$0xff] }
  0x26   :  { %v962_v43 = vld [vmem:[#allocation11 + $0x10] sm:$0xff]  ;;  %v1005_v49 = vld [vmem:[#allocation8] ss:$0 sm:$0xff]  ;;  %v961_v53 = vld [vmem:[#allocation11 + $0x8] sm:$0xff] }
  0x27   :  { %225 = vmatpush.bf16.msra.mxu0 %v949_v2  ;;  %331 = vmatpush.bf16.msra.mxu1 %v958_v24  ;;  %v1004_v46 = vld [vmem:[%s1385_s3] ss:$0 sm:$0xff]  ;;  %v960_v54 = vld [vmem:[#allocation11] sm:$0xff]  ;;  %v975_v2 = vld [vmem:[#allocation10 + $0x78] sm:$0xff] }
  0x28   :  { %v1006_v55 = vld [vmem:[%s1388_s6] ss:$0 sm:$0xff]  ;;  %520 = vmatpush.bf16.msra.mxu3 %v975_v2  ;;  %v968_v14 = vld [vmem:[#allocation10 + $0x40] sm:$0xff]  ;;  %v983_v15 = vld [vmem:[#allocation11 + $0x78] sm:$0xff] }
  0x29   :  { %412 = vmatpush.bf16.msra.mxu2 %v966_v34  ;;  %v1007_v61 = vld [vmem:[%s1390_s8] ss:$0 sm:$0xff]  ;;  %v1008_v31 = vld [vmem:[%s1385_s3 + $0x1] ss:$0 sm:$0xff]  ;;  %v1009_v34 = vld [vmem:[#allocation8 + $0x1] ss:$0 sm:$0xff] }
  0x2a   :  { %v974_v8 = vld [vmem:[#allocation10 + $0x70] sm:$0xff] }
  0x2b   :  { %226 = vmatpush.bf16.msra.mxu0 %v948_v3  ;;  %332 = vmatpush.bf16.msra.mxu1 %v957_v25  ;;  %v979_v25 = vld [vmem:[#allocation11 + $0x58] sm:$0xff] }
  0x2c   :  { %521 = vmatpush.bf16.msra.mxu3 %v974_v8  ;;  %v1012_v8 = vld [vmem:[%s1391_s9] ss:$0 sm:$0xff]  ;;  %s738_s9 = sshll.u32 %s1395_s13, 4  ;;  %s739_s9 = int_to_ptr.hbm [resolvable:$true] %s738_s9 }
  0x2d   :  { %413 = vmatpush.bf16.msra.mxu2 %v965_v36 }
  0x2f   :  { %227 = vmatpush.bf16.msra.mxu0 %v947_v4  ;;  %333 = vmatpush.bf16.msra.mxu1 %v956_v26 }
  0x31   :  { %414 = vmatpush.bf16.msra.mxu2 %v964_v37 }
  0x33   :  { %228 = vmatpush.bf16.msra.mxu0 %v946_v5  ;;  %334 = vmatpush.bf16.msra.mxu1 %v955_v27 }
  0x35   :  { %415 = vmatpush.bf16.msra.mxu2 %v963_v40  ;;  %v1010_v40 = vld [vmem:[%s1388_s6 + $0x1] ss:$0 sm:$0xff] }
  0x37   :  { %229 = vmatpush.bf16.msra.mxu0 %v945_v6  ;;  %335 = vmatpush.bf16.msra.mxu1 %v954_v28  ;;  %v978_v28 = vld [vmem:[#allocation11 + $0x50] sm:$0xff] }
  0x39   :  { %416 = vmatpush.bf16.msra.mxu2 %v962_v43 }
  0x3b   :  { %230 = vmatpush.bf16.msra.mxu0 %v944_v7  ;;  %336 = vmatpush.bf16.msra.mxu1 %v953_v29 }
  0x3d   :  { %417 = vmatpush.bf16.msra.mxu2 %v961_v53 }
  0x3e   :  { %231 = vmatmul.bf16.vlgmr.msra.gmra.mxu0 %v154_v9  ;;  %v973_v9 = vld [vmem:[#allocation10 + $0x68] sm:$0xff] }
  0x3f   :  { %337 = vmatpush.bf16.msra.mxu1 %v952_v30  ;;  %522 = vmatpush.bf16.msra.mxu3 %v973_v9 }
  0x40   :  { %602 = vmatpush.bf16.msrb.mxu0 %v983_v15 }
  0x41   :  { %418 = vmatpush.bf16.msra.mxu2 %v960_v54 }
  0xbb   :  { %v232_v11 = vpop.f32.mrf.mxu0 }
  0xbc   :  { %v1337_v12 = vadd.f32 %v1003_v10, %v232_v11  ;;  %v972_v10 = vld [vmem:[#allocation10 + $0x60] sm:$0xff]  ;;  %v971_v11 = vld [vmem:[#allocation10 + $0x58] sm:$0xff] }
  0xbd   :  { %523 = vmatpush.bf16.msra.mxu3 %v972_v10 }
  0xbe   :  { %238 = vadd.xlane.f32.xlu0 %v1337_v12 }
  0xc1   :  { %524 = vmatpush.bf16.msra.mxu3 %v971_v11  ;;  %v1013_v11 = vld [vmem:[%s1392_s10] ss:$0 sm:$0xff] }
  0xc3   :  { %v234_v13 = vpop.f32.mrf.mxu0 }
  0xc4   :  { %v969_v13 = vld [vmem:[#allocation10 + $0x48] sm:$0xff] }
 0x131   :  { %v239_v17 = vpop.xlane.xlu0 %238 }
 0x132   :  { %v240_v18 = vmul.f32 0.03125, %v239_v17 }
 0x134   :  { %v241_v21 = vsub.f32 %v1337_v12, %v240_v18  ;;  %v982_v18 = vld [vmem:[#allocation11 + $0x70] sm:$0xff] }
 0x135   :  { %603 = vmatpush.bf16.msrb.mxu0 %v982_v18 }
 0x136   :  { %v242_v22 = vmul.f32 %v1340_v20, %v241_v21  ;;  %v981_v21 = vld [vmem:[#allocation11 + $0x68] sm:$0xff] }
 0x138   :  { %v243_v23 = vmul.f32 %v242_v22, %v242_v22 }
 0x139   :  { %604 = vmatpush.bf16.msrb.mxu0 %v981_v21 }
 0x13a   :  { %244 = vadd.xlane.f32.xlu0 %v243_v23 }
 0x1ad   :  { %v245_v32 = vpop.xlane.xlu0 %244 }
 0x1ae   :  { %v246_v33 = vmul.f32 0.03125, %v245_v32 }
 0x1b0   :  { %v247_v35 = vadd.f32 1e-05, %v246_v33 }
 0x1b2   :  { %1015 = vrsqrt.f32 %v247_v35  ;;  %vm254_vm2 = vweird.f32 %v247_v35 }
 0x1b8   :  { %v1016_v38 = vpop.eup %1015 }
 0x1b9   :  { %v249_v39 = vmul.f32 %v1016_v38, %v247_v35  ;;  %vm255_vm1 = vweird.f32 %v1016_v38 }
 0x1ba   :  { %vm256_vm3 = vmor %vm254_vm2, %vm255_vm1 }
 0x1bb   :  { %v250_v41 = vmul.f32 %v1016_v38, %v249_v39  ;;  %v976_v39 = vld [vmem:[#allocation11 + $0x40] sm:$0xff] }
 0x1bd   :  { %v251_v42 = vmul.f32 0.5, %v250_v41 }
 0x1bf   :  { %v252_v44 = vsub.f32 1.5, %v251_v42 }
 0x1c1   :  { %v253_v45 = vmul.f32 %v1016_v38, %v252_v44 }
 0x1c3   :  { %v257_v47 = vsel %vm256_vm3, %v1016_v38, %v253_v45  ;;  %v977_v38 = vld [vmem:[#allocation11 + $0x48] sm:$0xff] }
 0x1c4   :  { %v258_v48 = vmul.f32 %v257_v47, %v242_v22  ;;  %v980_v22 = vld [vmem:[#allocation11 + $0x60] sm:$0xff] }
 0x1c5   :  { %605 = vmatpush.bf16.msrb.mxu0 %v980_v22 }
 0x1c6   :  { %v260_v50 = vmul.f32 %v1004_v46, %v258_v48  ;;  %v1011_v46 = vld [vmem:[%s1390_s8 + $0x1] ss:$0 sm:$0xff] }
 0x1c8   :  { %v262_v51 = vadd.f32 %v1005_v49, %v260_v50 }
 0x1c9   :  { %606 = vmatpush.bf16.msrb.mxu0 %v979_v25 }
 0x1ca   :  { %v263_v52 = vpack.c.bf16 %v262_v51, %v262_v51 }
 0x1cc   :  { %338 = vmatmul.bf16.vlgmr.msra.gmra.mxu1 %v263_v52 }
 0x1cd   :  { %607 = vmatpush.bf16.msrb.mxu0 %v978_v28 }
 0x1d1   :  { %608 = vmatpush.bf16.msrb.mxu0 %v977_v38 }
 0x1d5   :  { %609 = vmatpush.bf16.msrb.mxu0 %v976_v39 }
 0x249   :  { %v339_v56 = vpop.f32.mrf.mxu1 }
 0x24a   :  { %v340_v57 = vadd.f32 %v1006_v55, %v339_v56  ;;  %v991_v56 = vld [vmem:[#allocation13 + $0x38] sm:$0xff] }
 0x24b   :  { %717 = vmatpush.bf16.msrb.mxu1 %v991_v56 }
 0x24c   :  { %v343_v58 = vmax.f32 %v340_v57, 0.0  ;;  %v990_v57 = vld [vmem:[#allocation13 + $0x30] sm:$0xff] }
 0x24e   :  { %v344_v59 = vpack.c.bf16 %v343_v58, %v343_v58  ;;  %v989_v58 = vld [vmem:[#allocation13 + $0x28] sm:$0xff] }
 0x24f   :  { %718 = vmatpush.bf16.msrb.mxu1 %v990_v57 }
 0x250   :  { %419 = vmatmul.bf16.vlgmr.msra.gmra.mxu2 %v344_v59  ;;  %v988_v59 = vld [vmem:[#allocation13 + $0x20] sm:$0xff] }
 0x251   :  { %v341_v60 = vpop.f32.mrf.mxu1 }
 0x252   :  { %v987_v60 = vld [vmem:[#allocation13 + $0x18] sm:$0xff] }
 0x253   :  { %719 = vmatpush.bf16.msrb.mxu1 %v989_v58 }
 0x257   :  { %720 = vmatpush.bf16.msrb.mxu1 %v988_v59 }
 0x25b   :  { %721 = vmatpush.bf16.msrb.mxu1 %v987_v60 }
 0x2d3   :  { %v420_v62 = vpop.f32.mrf.mxu2 }
 0x2d4   :  { %v421_v63 = vadd.f32 %v1007_v61, %v420_v62  ;;  %v986_v61 = vld [vmem:[#allocation13 + $0x10] sm:$0xff]  ;;  %v985_v62 = vld [vmem:[#allocation13 + $0x8] sm:$0xff] }
 0x2d5   :  { %722 = vmatpush.bf16.msrb.mxu1 %v986_v61 }
 0x2d6   :  { %v1354_v0 = vadd.f32 %v421_v63, %v1337_v12  ;;  %v970_v12 = vld [vmem:[#allocation10 + $0x50] sm:$0xff]  ;;  %v984_v63 = vld [vmem:[#allocation13] sm:$0xff] }
 0x2d7   :  { %525 = vmatpush.bf16.msra.mxu3 %v970_v12 }
 0x2d8   :  { %427 = vadd.xlane.f32.xlu1 %v1354_v0 }
 0x2d9   :  { %723 = vmatpush.bf16.msrb.mxu1 %v985_v62 }
 0x2db   :  { %v422_v1 = vpop.f32.mrf.mxu2  ;;  %526 = vmatpush.bf16.msra.mxu3 %v969_v13 }
 0x2dd   :  { %724 = vmatpush.bf16.msrb.mxu1 %v984_v63 }
 0x2df   :  { %527 = vmatpush.bf16.msra.mxu3 %v968_v14 }
 0x34b   :  { %v428_v3 = vpop.xlane.xlu1 %427 }
 0x34c   :  { %v429_v4 = vmul.f32 0.03125, %v428_v3 }
 0x34e   :  { %v430_v5 = vsub.f32 %v1354_v0, %v429_v4 }
 0x350   :  { %v431_v6 = vmul.f32 %v1340_v20, %v430_v5 }
 0x352   :  { %v432_v7 = vmul.f32 %v431_v6, %v431_v6 }
 0x354   :  { %433 = vadd.xlane.f32.xlu1 %v432_v7 }
 0x3c7   :  { %v434_v16 = vpop.xlane.xlu1 %433 }
 0x3c8   :  { %v435_v17 = vmul.f32 0.03125, %v434_v16  ;;  %v1014_v16 = vld [vmem:[%s1394_s12] ss:$0 sm:$0xff] }
 0x3ca   :  { %v436_v19 = vadd.f32 1e-05, %v435_v17 }
 0x3cc   :  { %1017 = vrsqrt.f32 %v436_v19  ;;  %vm443_vm5 = vweird.f32 %v436_v19 }
 0x3d2   :  { %v1018_v23 = vpop.eup %1017 }
 0x3d3   :  { %v438_v24 = vmul.f32 %v1018_v23, %v436_v19  ;;  %vm444_vm4 = vweird.f32 %v1018_v23 }
 0x3d4   :  { %vm445_vm6 = vmor %vm443_vm5, %vm444_vm4 }
 0x3d5   :  { %v439_v26 = vmul.f32 %v1018_v23, %v438_v24 }
 0x3d7   :  { %v440_v27 = vmul.f32 0.5, %v439_v26 }
 0x3d9   :  { %v441_v29 = vsub.f32 1.5, %v440_v27 }
 0x3db   :  { %v442_v30 = vmul.f32 %v1018_v23, %v441_v29 }
 0x3dd   :  { %v446_v32 = vsel %vm445_vm6, %v1018_v23, %v442_v30 }
 0x3de   :  { %v447_v33 = vmul.f32 %v446_v32, %v431_v6 }
 0x3e0   :  { %v449_v35 = vmul.f32 %v1008_v31, %v447_v33 }
 0x3e2   :  { %v451_v36 = vadd.f32 %v1009_v34, %v449_v35 }
 0x3e4   :  { %v452_v37 = vpack.c.bf16 %v451_v36, %v451_v36 }
 0x3e6   :  { %528 = vmatmul.bf16.vlgmr.msra.gmra.mxu3 %v452_v37 }
 0x469   :  { %v529_v41 = vpop.f32.mrf.mxu3 }
 0x46a   :  { %v530_v42 = vadd.f32 %v1010_v40, %v529_v41 }
 0x46c   :  { %v533_v43 = vmax.f32 %v530_v42, 0.0 }
 0x46e   :  { %v534_v44 = vpack.c.bf16 %v533_v43, %v533_v43 }
 0x470   :  { %610 = vmatmul.bf16.vlgmr.msrb.gmra.mxu0 %v534_v44 }
 0x471   :  { %v531_v45 = vpop.f32.mrf.mxu3 }
 0x4ed   :  { %v611_v47 = vpop.f32.mrf.mxu0 }
 0x4ee   :  { %v612_v48 = vadd.f32 %v1011_v46, %v611_v47 }
 0x4f0   :  { %v615_v49 = vadd.f32 %v612_v48, %v1354_v0 }
 0x4f2   :  { %618 = vadd.xlane.f32.xlu2 %v615_v49 }
 0x4f5   :  { %v613_v50 = vpop.f32.mrf.mxu0 }
 0x565   :  { %v619_v51 = vpop.xlane.xlu2 %618 }
 0x566   :  { %v620_v52 = vmul.f32 0.03125, %v619_v51 }
 0x568   :  { %v621_v53 = vsub.f32 %v615_v49, %v620_v52 }
 0x56a   :  { %v622_v54 = vmul.f32 %v1340_v20, %v621_v53 }
 0x56c   :  { %v623_v55 = vmul.f32 %v622_v54, %v622_v54 }
 0x56e   :  { %624 = vadd.xlane.f32.xlu2 %v623_v55 }
 0x5e1   :  { %v625_v0 = vpop.xlane.xlu2 %624 }
 0x5e2   :  { %v626_v20 = vmul.f32 0.03125, %v625_v0 }
 0x5e4   :  { %v627_v1 = vadd.f32 1e-05, %v626_v20 }
 0x5e6   :  { %1019 = vrsqrt.f32 %v627_v1  ;;  %vm634_vm8 = vweird.f32 %v627_v1 }
 0x5ec   :  { %v1020_v2 = vpop.eup %1019 }
 0x5ed   :  { %v629_v3 = vmul.f32 %v1020_v2, %v627_v1  ;;  %vm635_vm7 = vweird.f32 %v1020_v2 }
 0x5ee   :  { %vm636_vm9 = vmor %vm634_vm8, %vm635_vm7 }
 0x5ef   :  { %v630_v4 = vmul.f32 %v1020_v2, %v629_v3 }
 0x5f1   :  { %v631_v5 = vmul.f32 0.5, %v630_v4 }
 0x5f3   :  { %v632_v6 = vsub.f32 1.5, %v631_v5 }
 0x5f5   :  { %v633_v7 = vmul.f32 %v1020_v2, %v632_v6 }
 0x5f7   :  { %v637_v9 = vsel %vm636_vm9, %v1020_v2, %v633_v7 }
 0x5f8   :  { %v638_v10 = vmul.f32 %v637_v9, %v622_v54 }
 0x5fa   :  { %v642_v12 = vmul.f32 %v1012_v8, %v638_v10 }
 0x5fc   :  { %v646_v13 = vadd.f32 %v1013_v11, %v642_v12 }
 0x5fe   :  { %v647_v14 = vmax.f32 %v646_v13, 0.0 }
 0x600   :  { %v648_v15 = vpack.c.bf16 %v647_v14, %v647_v14 }
 0x602   :  { %725 = vmatmul.bf16.vlgmr.msrb.gmra.mxu1 %v648_v15 }
 0x67f   :  { %v726_v17 = vpop.f32.mrf.mxu1 }
 0x680   :  { %v727_v18 = vadd.f32 %v1014_v16, %v726_v17 }
 0x682   :  { %730 = vst [vmem:[#allocation14] sm:$0xff] %v727_v18 }
 0x683   :  { %741 = dma.vmem_to_hbm [thread:$0]  %s737_s18, 128, %s739_s9, [#allocation4]  }
 0x687   :  { %v728_v19 = vpop.f32.mrf.mxu1 }
 0x688   :  { %1221 = dma.done.wait [#allocation4], 128  }
 0x689   :  { %1222 = vsyncadd [#allocation4], 4294967168 }
 0x68a   :  { %746 = vsyncpa [#allocation3], 1 }
 0x68b   :  { %747 = vsyncpa [#allocation6], 1 }
 0x68c   :  { %748 = vsyncpa [#allocation9], 1 }
 0x68d   :  { %749 = vsyncpa [#allocation12], 1 }
 0x68e   :  { %750 = vsyncpa [#allocation4], 1 }

</bundles_post_ra>
